<compile_context>
chip_gen: v7x
topology: tpu7x:2x2x1
jax: 0.10.0
libtpu: 0.0.40
codegen_flags: <defaults>
</compile_context>

<pallas_src>
import functools

import jax
import jax.numpy as jnp
from jax.experimental import pallas as pl
from jax.experimental.pallas import tpu as pltpu

H_PAD = 128  # padded hidden / output lane width (MXU tile width)


def _round_up(x, m):
    return ((x + m - 1) // m) * m


def qnetwork_kernel(x_ref, w_ref, b_ref, out_ref):
    """One batch tile: (TB, S_PAD) bf16 in -> (TB, 128) f32 Q-value slab out."""
    s_pad = x_ref.shape[-1]      # padded state feature width
    h_pad = out_ref.shape[-1]    # 128

    x = x_ref[...]                                        # (TB, S_PAD) bf16

    # Static, tile-aligned slices of the packed parameter slabs (no data movement).
    w0 = w_ref[0:s_pad, 0:h_pad]                          # (S_PAD, 128) bf16
    w1 = w_ref[0:h_pad, h_pad:2 * h_pad]                  # (128, 128)  bf16
    w2 = w_ref[0:h_pad, 2 * h_pad:3 * h_pad]              # (128, 128)  bf16
    b0 = b_ref[:, 0:h_pad]                                # (1, 128) f32
    b1 = b_ref[:, h_pad:2 * h_pad]
    b2 = b_ref[:, 2 * h_pad:3 * h_pad]

    # input_layer + input_relu  (bf16 operands, f32 MXU accumulation)
    h = jnp.dot(x, w0, preferred_element_type=jnp.float32) + b0
    h = jnp.maximum(h, 0.0).astype(jnp.bfloat16)
    # fc0 + fc_relu0
    h = jnp.dot(h, w1, preferred_element_type=jnp.float32) + b1
    h = jnp.maximum(h, 0.0).astype(jnp.bfloat16)
    # logit (no activation); lanes >= action_size are zero by construction.
    out_ref[...] = (
        jnp.dot(h, w2, preferred_element_type=jnp.float32) + b2
    ).astype(out_ref.dtype)


@functools.partial(jax.jit, static_argnames=("action_size", "tb_max"))
def qnetwork_forward(x, w_pack, b_pack, *, action_size, tb_max=512):
    """x: (batch, state_size) f32. w_pack: (K_PAD, 3*128) bf16. b_pack: (1, 3*128) f32."""
    batch, state = x.shape
    s_pad = _round_up(state, 16)                # bf16 sublane packing
    h_pad = b_pack.shape[1] // 3                # 128
    k_pad = w_pack.shape[0]

    # Batch tile: large multiple of 16, capped so VMEM stays bounded for any batch.
    tb = min(tb_max, _round_up(batch, 16))
    b_pad = _round_up(batch, tb)

    # Zero-pad batch rows / feature lanes and cast to bf16 once, outside the kernel.
    x_p = jnp.zeros((b_pad, s_pad), jnp.bfloat16)
    x_p = x_p.at[:batch, :state].set(x.astype(jnp.bfloat16))

    out = pl.pallas_call(
        qnetwork_kernel,
        out_shape=jax.ShapeDtypeStruct((b_pad, h_pad), jnp.float32),
        grid_spec=pltpu.PrefetchScalarGridSpec(
            num_scalar_prefetch=0,
            grid=(b_pad // tb,),
            in_specs=[
                pl.BlockSpec((tb, s_pad), lambda i: (i, 0)),        # x: batch-tiled
                pl.BlockSpec((k_pad, 3 * h_pad), lambda i: (0, 0)),  # weights: resident
                pl.BlockSpec((1, 3 * h_pad), lambda i: (0, 0)),      # biases:  resident
            ],
            out_specs=pl.BlockSpec((tb, h_pad), lambda i: (i, 0)),   # lane-dense slab
        ),
        compiler_params=pltpu.CompilerParams(
            dimension_semantics=("parallel",),   # shard batch tiles across v7x TCs
        ),
    )(x_p, w_pack, b_pack)

    return out[:batch, :action_size]


def init_params(key, state_size, action_size, fc_sizes=(64, 64)):
    """Synthetic init matching PyTorch Linear shapes (weights stored (in, out))."""
    dims = [state_size, fc_sizes[0], fc_sizes[1], action_size]
    params = {}
    for i in range(3):
        key, kw, kb = jax.random.split(key, 3)
        fan_in, fan_out = dims[i], dims[i + 1]
        bound = 1.0 / jnp.sqrt(jnp.float32(fan_in))
        params[f"w{i}"] = jax.random.uniform(kw, (fan_in, fan_out), jnp.float32, -bound, bound)
        params[f"b{i}"] = jax.random.uniform(kb, (1, fan_out), jnp.float32, -bound, bound)
    return params


def pack_params(params, state_size, action_size, fc_sizes=(64, 64)):
    """Pack 3 Linear layers into one bf16 weight slab + one f32 bias row, zero-padded
    to 128-lane-aligned blocks so in-kernel slices are tile-aligned and matmuls are
    MXU-tile dense. Zero padding keeps the math exactly equivalent."""
    h0, h1 = fc_sizes
    s_pad = _round_up(state_size, 16)
    k_pad = max(s_pad, H_PAD)

    w = jnp.zeros((k_pad, 3 * H_PAD), jnp.float32)
    w = w.at[:state_size, 0:h0].set(params["w0"])
    w = w.at[:h0, H_PAD:H_PAD + h1].set(params["w1"])
    w = w.at[:h1, 2 * H_PAD:2 * H_PAD + action_size].set(params["w2"])

    b = jnp.zeros((1, 3 * H_PAD), jnp.float32)
    b = b.at[:, 0:h0].set(params["b0"])
    b = b.at[:, H_PAD:H_PAD + h1].set(params["b1"])
    b = b.at[:, 2 * H_PAD:2 * H_PAD + action_size].set(params["b2"])

    return w.astype(jnp.bfloat16), b


def qnetwork_ref_f32(x, params):
    """Pure-JAX f32 reference (exact PyTorch semantics)."""
    h = jnp.maximum(x @ params["w0"] + params["b0"], 0.0)
    h = jnp.maximum(h @ params["w1"] + params["b1"], 0.0)
    return h @ params["w2"] + params["b2"]


def qnetwork_ref_bf16(x, params):
    """Pure-JAX reference using the same bf16-operand / f32-accumulate recipe."""
    bf = jnp.bfloat16
    h = jnp.dot(x.astype(bf), params["w0"].astype(bf),
                preferred_element_type=jnp.float32) + params["b0"]
    h = jnp.maximum(h, 0.0).astype(bf)
    h = jnp.dot(h, params["w1"].astype(bf),
                preferred_element_type=jnp.float32) + params["b1"]
    h = jnp.maximum(h, 0.0).astype(bf)
    return jnp.dot(h, params["w2"].astype(bf),
                   preferred_element_type=jnp.float32) + params["b2"]


if __name__ == "__main__":
    key = jax.random.PRNGKey(0)
    batch, state_size, action_size = 8, 16, 4

    key, kx = jax.random.split(key)
    x = jax.random.normal(kx, (batch, state_size), jnp.float32)
    params = init_params(key, state_size, action_size)
    w_pack, b_pack = pack_params(params, state_size, action_size)

    # Small-batch run (single grid step).
    out = qnetwork_forward(x, w_pack, b_pack, action_size=action_size)
    out = jax.block_until_ready(out)
    assert out.shape == (batch, action_size), out.shape
    assert jnp.allclose(out, qnetwork_ref_bf16(x, params), atol=5e-3, rtol=5e-3), \
        "mismatch vs bf16-matched reference"
    assert jnp.allclose(out, qnetwork_ref_f32(x, params), atol=5e-2, rtol=5e-2), \
        "mismatch vs f32 reference"

    # Multi-tile run to exercise the batch grid + resident-weight index maps.
    key, kx2 = jax.random.split(key)
    x2 = jax.random.normal(kx2, (256, state_size), jnp.float32)
    out2 = qnetwork_forward(x2, w_pack, b_pack, action_size=action_size, tb_max=64)
    out2 = jax.block_until_ready(out2)
    assert out2.shape == (256, action_size), out2.shape
    assert jnp.allclose(out2, qnetwork_ref_bf16(x2, params), atol=5e-3, rtol=5e-3), \
        "multi-tile mismatch vs bf16-matched reference"

    print("KERNEL_OK")
</pallas_src>

<mosaic_0001>
module attributes {stable_mosaic.version = 11 : i64} {
  func.func @qnetwork_kernel(%arg0: i32, %arg1: memref<16x16xbf16, #tpu.memory_space<vmem>>, %arg2: memref<128x384xbf16, #tpu.memory_space<vmem>>, %arg3: memref<1x384xf32, #tpu.memory_space<vmem>>, %arg4: memref<16x128xf32, #tpu.memory_space<vmem>>) attributes {dimension_semantics = [#tpu.dimension_semantics<parallel>], iteration_bounds = array<i64: 1>, scalar_prefetch = 0 : i64, scratch_operands = 0 : i64, tpu.core_type = #tpu.core_type<tc>, window_params = [{transform_indices = @transform_0, window_bounds = array<i64: 16, 16>}, {pipeline_mode = #tpu.pipeline_mode<synchronous>, transform_indices = @transform_1, window_bounds = array<i64: 128, 384>}, {pipeline_mode = #tpu.pipeline_mode<synchronous>, transform_indices = @transform_2, window_bounds = array<i64: 1, 384>}, {transform_indices = @transform_3, window_bounds = array<i64: 16, 128>}]} {
    %c0 = arith.constant 0 : index
    %c0_0 = arith.constant 0 : index
    %0 = vector.load %arg1[%c0, %c0_0] : memref<16x16xbf16, #tpu.memory_space<vmem>>, vector<16x16xbf16>
    %c0_1 = arith.constant 0 : index
    %c0_2 = arith.constant 0 : index
    %1 = vector.load %arg2[%c0_1, %c0_2] : memref<128x384xbf16, #tpu.memory_space<vmem>>, vector<16x128xbf16>
    %c0_3 = arith.constant 0 : index
    %c128 = arith.constant 128 : index
    %2 = vector.load %arg2[%c0_3, %c128] : memref<128x384xbf16, #tpu.memory_space<vmem>>, vector<128x128xbf16>
    %c0_4 = arith.constant 0 : index
    %c256 = arith.constant 256 : index
    %3 = vector.load %arg2[%c0_4, %c256] : memref<128x384xbf16, #tpu.memory_space<vmem>>, vector<128x128xbf16>
    %c0_5 = arith.constant 0 : index
    %c0_6 = arith.constant 0 : index
    %4 = vector.load %arg3[%c0_5, %c0_6] : memref<1x384xf32, #tpu.memory_space<vmem>>, vector<1x128xf32>
    %c0_7 = arith.constant 0 : index
    %c128_8 = arith.constant 128 : index
    %5 = vector.load %arg3[%c0_7, %c128_8] : memref<1x384xf32, #tpu.memory_space<vmem>>, vector<1x128xf32>
    %c0_9 = arith.constant 0 : index
    %c256_10 = arith.constant 256 : index
    %6 = vector.load %arg3[%c0_9, %c256_10] : memref<1x384xf32, #tpu.memory_space<vmem>>, vector<1x128xf32>
    %cst = arith.constant dense<0.000000e+00> : vector<16x128xf32>
    %7 = tpu.matmul %0, %1, %cst {dimension_numbers = #tpu.dot_dimension_numbers<[1], [0], [0], [1], [0, 0, 1, 1], [], []>} : vector<16x16xbf16>, vector<16x128xbf16>, vector<16x128xf32> -> vector<16x128xf32>
    %8 = vector.broadcast %4 : vector<1x128xf32> to vector<16x128xf32>
    %9 = arith.addf %7, %8 : vector<16x128xf32>
    %cst_11 = arith.constant 0.000000e+00 : f32
    %10 = vector.broadcast %cst_11 : f32 to vector<16x128xf32>
    %11 = arith.maximumf %9, %10 : vector<16x128xf32>
    %12 = arith.truncf %11 : vector<16x128xf32> to vector<16x128xbf16>
    %cst_12 = arith.constant dense<0.000000e+00> : vector<16x128xf32>
    %13 = tpu.matmul %12, %2, %cst_12 {dimension_numbers = #tpu.dot_dimension_numbers<[1], [0], [0], [1], [0, 0, 1, 1], [], []>} : vector<16x128xbf16>, vector<128x128xbf16>, vector<16x128xf32> -> vector<16x128xf32>
    %14 = vector.broadcast %5 : vector<1x128xf32> to vector<16x128xf32>
    %15 = arith.addf %13, %14 : vector<16x128xf32>
    %cst_13 = arith.constant 0.000000e+00 : f32
    %16 = vector.broadcast %cst_13 : f32 to vector<16x128xf32>
    %17 = arith.maximumf %15, %16 : vector<16x128xf32>
    %18 = arith.truncf %17 : vector<16x128xf32> to vector<16x128xbf16>
    %cst_14 = arith.constant dense<0.000000e+00> : vector<16x128xf32>
    %19 = tpu.matmul %18, %3, %cst_14 {dimension_numbers = #tpu.dot_dimension_numbers<[1], [0], [0], [1], [0, 0, 1, 1], [], []>} : vector<16x128xbf16>, vector<128x128xbf16>, vector<16x128xf32> -> vector<16x128xf32>
    %20 = vector.broadcast %6 : vector<1x128xf32> to vector<16x128xf32>
    %21 = arith.addf %19, %20 : vector<16x128xf32>
    %c0_15 = arith.constant 0 : index
    %c0_16 = arith.constant 0 : index
    %22 = vector.load %arg4[%c0_15, %c0_16] : memref<16x128xf32, #tpu.memory_space<vmem>>, vector<16x128xf32>
    tpu.vector_store %arg4[%c0_15, %c0_16], %21 {strides = array<i32>} : memref<16x128xf32, #tpu.memory_space<vmem>>, vector<16x128xf32>,
    return
  }
  func.func @transform_0(%arg0: i32) -> (i32, i32) {
    %c0_i32 = arith.constant 0 : i32
    %c0_i32_0 = arith.constant 0 : i32
    return %arg0, %c0_i32 : i32, i32
  }
  func.func @transform_1(%arg0: i32) -> (i32, i32) {
    %c0_i32 = arith.constant 0 : i32
    %c0_i32_0 = arith.constant 0 : i32
    %c0_i32_1 = arith.constant 0 : i32
    return %c0_i32, %c0_i32_0 : i32, i32
  }
  func.func @transform_2(%arg0: i32) -> (i32, i32) {
    %c0_i32 = arith.constant 0 : i32
    %c0_i32_0 = arith.constant 0 : i32
    %c0_i32_1 = arith.constant 0 : i32
    return %c0_i32, %c0_i32_0 : i32, i32
  }
  func.func @transform_3(%arg0: i32) -> (i32, i32) {
    %c0_i32 = arith.constant 0 : i32
    %c0_i32_0 = arith.constant 0 : i32
    return %arg0, %c0_i32 : i32, i32
  }
}

</mosaic_0001>

<bundles_post_ra>
// kernel: qnetwork_forward.1
= control target key start
LH: loop header
LB: loop body
LE: loop exit
PB: predicated region body
PF: predicated region fallthrough
CT: control target
= control target key end

     0   :  { %8 = vsyncpa [#allocation3], 0  ;;  %s468_s12 = smov [#allocation2]   ;;  %s543_s0 = inlined_call_operand.vmem [shape: bf16[16,16], index: 0, kind: input, shape index: {}]   ;;  %s544_s1 = inlined_call_operand.hbm [shape: bf16[128,384], index: 1, kind: input, shape index: {}]   ;;  %s545_s2 = inlined_call_operand.vmem [shape: f32[1,384], index: 2, kind: input, shape index: {}]   ;;  %s546_s3 = inlined_call_operand.vmem [shape: f32[16,128], index: 3, kind: output, shape index: {}]  }
   0x1   :  { %s16_s13 = sshll.u32 %s468_s12, 4  ;;  %s444_s16 = scalar_lea.hbm %s544_s1, 3072  ;;  %s17_s13 = int_to_ptr.vmem [resolvable:$true] %s16_s13 }
   0x2   :  { %p445_p0 = scmp.ne.s32.totalorder %s544_s1, %s444_s16  ;;  %p448_p1 = scmp.lt.u32.totalorder %s444_s16, %s544_s1 }
   0x4   :  { %p450_p2 = pnand %p448_p1, %p445_p0 }
   0x6   :  { %453 = shalt.err (!%p450_p2)
}
   0x7   :  { %s454_s21 = scalar_lea.vmem %s17_s13, 3072  ;;  %p459_p4 = scmp.lt.s32.totalorder %s17_s13, %s17_s13 }
   0x8   :  { %p455_p3 = scmp.ne.s32.totalorder %s17_s13, %s454_s21  ;;  %p460_p5 = scmp.lt.s32.totalorder %s454_s21, %s454_s21 }
   0xa   :  { %p461_p6 = por %p460_p5, %p459_p4 }
   0xc   :  { %p462_p7 = pnand %p461_p6, %p455_p3 }
   0xe   :  { %465 = shalt.err (!%p462_p7)
}
   0xf   :  { %s469_s22 = smov 192   ;;  %s470_s23 = smov 12  }
  0x10   :  { %22 = dma.hbm_to_vmem [thread:$0]  %s544_s1, 3072, %s17_s13, [#allocation3], %s469_s22, %s469_s22, %s470_s23  }
  0x11   :  { %466 = dma.done.wait [#allocation3], 3072  }
  0x12   :  { %467 = vsyncadd [#allocation3], 4294964224  ;;  %v471_v0 = vmov 0.0   ;;  %vm472_vm0 = vmmov 0   ;;  %v426_v1 = vld [vmem:[#allocation2] ss:$12 sps:$4 sm:$0xff]  }
  0x13   :  { %375 = vmatprep.subr.bf16.mxu0 %v471_v0  ;;  %377 = vmatprep.mubr.msk.bf16.mxu0 %vm472_vm0, %v471_v0  ;;  %v427_v2 = vld [vmem:[%s543_s0] sm:$0xff]   ;;  %vm85_vm1 = vcmask 130048   ;;  %v429_v4 = vld [vmem:[#allocation2 + $0x1c] ss:$12 sps:$4 sm:$0xff]   ;;  %v431_v6 = vld [vmem:[#allocation2 + $0x4c] ss:$12 sps:$4 sm:$0xff]  }
  0x14   :  { %381 = vmatprep.subr.bf16.mxu1 %v471_v0  ;;  %397 = vmatprep.mubr.msk.bf16.mxu1 %vm472_vm0, %v471_v0  ;;  %v428_v3 = vld [vmem:[#allocation2 + $0x4] ss:$12 sps:$4 sm:$0xff]   ;;  %v430_v5 = vld [vmem:[#allocation2 + $0x34] ss:$12 sps:$4 sm:$0xff]   ;;  %v433_v8 = vld [vmem:[#allocation2 + $0x7c] ss:$12 sps:$4 sm:$0xff]  }
  0x15   :  { %376 = vmatpush3.bf16.msra.mxu0 %v426_v1  ;;  %382 = vmatpush3.bf16.msra.mxu1 %v428_v3  ;;  %v432_v7 = vld [vmem:[#allocation2 + $0x64] ss:$12 sps:$4 sm:$0xff]   ;;  %v434_v9 = vld [vmem:[#allocation2 + $0x94] ss:$12 sps:$4 sm:$0xff]   ;;  %v435_v10 = vld [vmem:[#allocation2 + $0xac] ss:$12 sps:$4 sm:$0xff]  }
  0x16   :  { %401 = vmatprep.subr.bf16.mxu0 %v471_v0  ;;  %383 = vmatprep.subr.bf16.mxu1 %v471_v0  ;;  %v436_v11 = vld [vmem:[#allocation2 + $0x8] ss:$12 sps:$4 sm:$0xff]   ;;  %v437_v12 = vld [vmem:[#allocation2 + $0x20] ss:$12 sps:$4 sm:$0xff]   ;;  %v438_v13 = vld [vmem:[#allocation2 + $0x38] ss:$12 sps:$4 sm:$0xff]  }
  0x17   :  { %v439_v14 = vld [vmem:[#allocation2 + $0x50] ss:$12 sps:$4 sm:$0xff]   ;;  %v440_v15 = vld [vmem:[#allocation2 + $0x68] ss:$12 sps:$4 sm:$0xff]   ;;  %v441_v16 = vld [vmem:[#allocation2 + $0x80] ss:$12 sps:$4 sm:$0xff]  }
  0x18   :  { %378 = vmatmul.mubr.msk.bf16.vlgmr.msra.gmra.mrb[0].mxu0 %vm85_vm1, %v427_v2  ;;  %v333_v17 = vld [vmem:[%s545_s2] ss:$0 sm:$0xff]  ;;  %v442_v27 = vld [vmem:[#allocation2 + $0x98] ss:$12 sps:$4 sm:$0xff]   ;;  %v443_v28 = vld [vmem:[#allocation2 + $0xb0] ss:$12 sps:$4 sm:$0xff]  }
  0x19   :  { %417 = vmatprep.mubr.msk.bf16.mxu0 %vm472_vm0, %v471_v0  ;;  %384 = vmatpush3.bf16.msra.mxu1 %v429_v4  ;;  %v337_v29 = vld [vmem:[%s545_s2 + $0x1] ss:$0 sm:$0xff]  ;;  %v346_v39 = vld [vmem:[%s545_s2 + $0x2] ss:$0 sm:$0xff] }
  0x1a   :  { %385 = vmatprep.subr.bf16.mxu1 %v471_v0  ;;  %402 = vmatpush3.bf16.msra.mxu0 %v436_v11 }
  0x1b   :  { %403 = vmatprep.subr.bf16.mxu0 %v471_v0 }
  0x1d   :  { %386 = vmatpush3.bf16.msra.mxu1 %v430_v5 }
  0x1e   :  { %387 = vmatprep.subr.bf16.mxu1 %v471_v0  ;;  %404 = vmatpush3.bf16.msra.mxu0 %v437_v12 }
  0x1f   :  { %405 = vmatprep.subr.bf16.mxu0 %v471_v0 }
  0x21   :  { %388 = vmatpush3.bf16.msra.mxu1 %v431_v6 }
  0x22   :  { %389 = vmatprep.subr.bf16.mxu1 %v471_v0  ;;  %406 = vmatpush3.bf16.msra.mxu0 %v438_v13 }
  0x23   :  { %407 = vmatprep.subr.bf16.mxu0 %v471_v0 }
  0x25   :  { %390 = vmatpush3.bf16.msra.mxu1 %v432_v7 }
  0x26   :  { %391 = vmatprep.subr.bf16.mxu1 %v471_v0  ;;  %408 = vmatpush3.bf16.msra.mxu0 %v439_v14 }
  0x27   :  { %409 = vmatprep.subr.bf16.mxu0 %v471_v0 }
  0x29   :  { %392 = vmatpush3.bf16.msra.mxu1 %v433_v8 }
  0x2a   :  { %393 = vmatprep.subr.bf16.mxu1 %v471_v0  ;;  %410 = vmatpush3.bf16.msra.mxu0 %v440_v15 }
  0x2b   :  { %411 = vmatprep.subr.bf16.mxu0 %v471_v0 }
  0x2d   :  { %394 = vmatpush3.bf16.msra.mxu1 %v434_v9 }
  0x2e   :  { %395 = vmatprep.subr.bf16.mxu1 %v471_v0  ;;  %412 = vmatpush3.bf16.msra.mxu0 %v441_v16 }
  0x2f   :  { %413 = vmatprep.subr.bf16.mxu0 %v471_v0 }
  0x31   :  { %396 = vmatpush3.bf16.msra.mxu1 %v435_v10 }
  0x32   :  { %414 = vmatpush3.bf16.msra.mxu0 %v442_v27 }
  0x33   :  { %415 = vmatprep.subr.bf16.mxu0 %v471_v0 }
  0x36   :  { %416 = vmatpush3.bf16.msra.mxu0 %v443_v28 }
  0xeb   :  { %v123_v18 = vpop.f32.mrb[0].mxu0 }
  0xec   :  { %v124_v19 = vadd.f32 %v333_v17, %v123_v18  ;;  %v379_v20 = vpop.f32.mrb[1].mxu0 }
  0xed   :  { %v126_v21 = vpop.f32.mrb[2].mxu0 }
  0xee   :  { %v127_v22 = vadd.f32 %v333_v17, %v126_v21  ;;  %v380_v23 = vpop.f32.mrb[3].mxu0  ;;  %v130_v24 = vmax.f32 %v124_v19, 0.0 }
  0xf0   :  { %v131_v25 = vmax.f32 %v127_v22, 0.0 }
  0xf2   :  { %v132_v26 = vpack.c.bf16 %v131_v25, %v130_v24 }
  0xf4   :  { %398 = vmatmul.mubr.bf16.vlgmr.msra.gmra.mrb[0].mxu1 %v132_v26 }
 0x1c7   :  { %v221_v30 = vpop.f32.mrb[0].mxu1 }
 0x1c8   :  { %v222_v31 = vadd.f32 %v337_v29, %v221_v30  ;;  %v399_v32 = vpop.f32.mrb[1].mxu1 }
 0x1c9   :  { %v224_v33 = vpop.f32.mrb[2].mxu1 }
 0x1ca   :  { %v225_v34 = vadd.f32 %v337_v29, %v224_v33  ;;  %v400_v35 = vpop.f32.mrb[3].mxu1  ;;  %v228_v36 = vmax.f32 %v222_v31, 0.0 }
 0x1cc   :  { %v229_v37 = vmax.f32 %v225_v34, 0.0 }
 0x1ce   :  { %v230_v38 = vpack.c.bf16 %v229_v37, %v228_v36 }
 0x1d0   :  { %418 = vmatmul.mubr.bf16.vlgmr.msra.gmra.mrb[4].mxu0 %v230_v38 }
 0x2a3   :  { %v319_v40 = vpop.f32.mrb[4].mxu0 }
 0x2a4   :  { %v320_v41 = vadd.f32 %v346_v39, %v319_v40  ;;  %v419_v42 = vpop.f32.mrb[5].mxu0 }
 0x2a5   :  { %v322_v43 = vpop.f32.mrb[6].mxu0 }
 0x2a6   :  { %326 = vst [vmem:[%s546_s3] sm:$0xff] %v320_v41  ;;  %v323_v44 = vadd.f32 %v346_v39, %v322_v43  ;;  %v420_v45 = vpop.f32.mrb[7].mxu0 }
 0x2a8   :  { %327 = vst [vmem:[%s546_s3 + $0x8] sm:$0xff] %v323_v44 }
 0x2a9   :  { %332 = vsyncpa [#allocation3], 1 }

</bundles_post_ra>
